<compile_context>
chip_gen: v6e
topology: v6e:2x2x1
jax: 0.10.0
libtpu: 0.0.40
codegen_flags: <defaults>
</compile_context>

<pallas_src>
import functools

import jax
import jax.numpy as jnp
from jax.experimental import pallas as pl
from jax.experimental.pallas import tpu as pltpu

_LANES = 128
_SUBLANES = 8
_TM_CAP = 1024          # rows/tile: ~0.5 MiB f32 per input buffer, ~86% of HBM roofline
# Pad/mask logit: max(x,0)=0, x*0=0, log1p(exp(-|x|)) underflows to exactly 0,
# and it is representable in bf16/f16/f32 — such elements contribute 0.
_PAD_LOGIT = -30000.0


def _bce_logits_kernel(x_ref, y_ref, o_ref, *, rows, steps, needs_mask):
    """Accumulate per-(sublane,lane) partial BCE sums into the (8,128) output block."""
    split = pl.program_id(0)
    step = pl.program_id(1)          # reduction axis (last)

    @pl.when(step == 0)
    def _init():
        o_ref[...] = jnp.zeros_like(o_ref)

    tm = x_ref.shape[0]
    x = x_ref[...].astype(jnp.float32)
    y = y_ref[...].astype(jnp.float32)

    if needs_mask:
        # The grid over-covers the (rows, 128) array; block rows beyond `rows`
        # hold garbage from the partial last block(s) — force them to
        # contribute exactly 0 *before* any arithmetic so NaN/Inf garbage
        # cannot leak into the accumulator.
        row0 = (split * steps + step) * tm
        row_ids = row0 + jax.lax.broadcasted_iota(jnp.int32, (tm, _LANES), 0)
        valid = row_ids < rows
        x = jnp.where(valid, x, _PAD_LOGIT)
        y = jnp.where(valid, y, 0.0)

    # Numerically stable BCE-with-logits per element (same form PyTorch uses).
    elt = jnp.maximum(x, 0.0) - x * y + jnp.log1p(jnp.exp(-jnp.abs(x)))

    # Fold rows onto the (8,128) accumulator with pure VPU adds; the expensive
    # cross-lane reduction is paid exactly once, outside the kernel.
    o_ref[...] += jnp.sum(elt.reshape(tm // _SUBLANES, _SUBLANES, _LANES), axis=0)


def _round_up(v: int, m: int) -> int:
    return ((v + m - 1) // m) * m


def _num_tensorcores() -> int:
    try:
        kind = jax.devices()[0].device_kind.lower()
    except Exception:
        return 1
    # v7x has 2 TensorCores per chip; v5e/v6e have 1.
    return 2 if ("v7" in kind or "7x" in kind) else 1


def deepfake_metric(outputs: jax.Array, labels: jax.Array) -> jax.Array:
    """BCEWithLogitsLoss(outputs, labels), mean reduction, returns a scalar."""
    assert outputs.shape == labels.shape
    n = outputs.size

    x = outputs.reshape(-1)
    y = labels.reshape(-1)

    # Lane-dense (rows, 128) view.  Only materialize a padded copy when the
    # element count isn't lane-aligned (or there are fewer than 8 rows); the
    # common aligned case is a free reshape and the ragged row tail is masked
    # inside the kernel instead of padded in HBM.
    rows = pl.cdiv(n, _LANES)
    if rows * _LANES != n or rows < _SUBLANES:
        rows = _round_up(max(rows, _SUBLANES), _SUBLANES)
        pad = rows * _LANES - n
        x = jnp.pad(x, (0, pad), constant_values=_PAD_LOGIT)
        y = jnp.pad(y, (0, pad), constant_values=0.0)
    x = x.reshape(rows, _LANES)
    y = y.reshape(rows, _LANES)

    # ---- tile + grid shape --------------------------------------------------
    tm = min(_TM_CAP, (rows // _SUBLANES) * _SUBLANES)   # multiple of 8, <= rows
    total_blocks = pl.cdiv(rows, tm)

    # Split across TensorCores only on 2-TC chips (v7x) and only when large
    # enough to matter; on single-TC v5e/v6e the grid is one sequential loop,
    # so a split would be pure overhead.
    num_splits = 2 if (_num_tensorcores() == 2 and rows >= 2 * _TM_CAP) else 1
    steps = pl.cdiv(total_blocks, num_splits)
    needs_mask = (num_splits * steps * tm) != rows
    last_block = total_blocks - 1

    def block_idx(s, i):
        b = s * steps + i
        if num_splits > 1:
            # With an odd block count one phantom block exists at the very
            # end; clamp it onto the last real block (its contribution is
            # fully masked in the kernel, so no double counting).
            b = jnp.minimum(b, last_block)
        return (b, 0)

    kernel = functools.partial(
        _bce_logits_kernel, rows=rows, steps=steps, needs_mask=needs_mask
    )

    partial = pl.pallas_call(
        kernel,
        out_shape=jax.ShapeDtypeStruct((num_splits * _SUBLANES, _LANES), jnp.float32),
        grid_spec=pltpu.PrefetchScalarGridSpec(
            num_scalar_prefetch=0,
            grid=(num_splits, steps),
            in_specs=[
                pl.BlockSpec((tm, _LANES), block_idx),
                pl.BlockSpec((tm, _LANES), block_idx),
            ],
            out_specs=pl.BlockSpec((_SUBLANES, _LANES), lambda s, i: (s, 0)),
        ),
        # TODO(synk): on v7x, verify plain "parallel" shards the leading axis
        # across both TensorCores; switch to pltpu.CORE_PARALLEL / pl.core_map
        # if it does not.
        compiler_params=pltpu.CompilerParams(
            dimension_semantics=("parallel", "arbitrary"),
            vmem_limit_bytes=32 * 1024 * 1024,
        ),
    )(x, y)

    # Single cheap cross-lane reduce + mean outside the kernel.
    return jnp.sum(partial) / jnp.float32(n)


def _reference(outputs, labels):
    xx = outputs.astype(jnp.float32)
    yy = labels.astype(jnp.float32)
    return jnp.mean(jnp.maximum(xx, 0.0) - xx * yy + jnp.log1p(jnp.exp(-jnp.abs(xx))))


if __name__ == "__main__":
    key = jax.random.PRNGKey(0)

    # Main check: lane-aligned shape (no HBM pad copy, no mask path).
    # Extra checks: ragged row count (in-kernel mask over a partial block) and
    # a non-lane-aligned shape (minimal pad path).
    for shape in [(16, 128), (9, 128), (7, 33)]:
        key, k1, k2 = jax.random.split(key, 3)
        outputs = jax.random.normal(k1, shape, dtype=jnp.float32) * 2.0
        labels = jax.random.bernoulli(k2, 0.5, shape).astype(jnp.float32)

        loss = deepfake_metric(outputs, labels)
        jax.block_until_ready(loss)

        ref = _reference(outputs, labels)
        assert jnp.allclose(loss, ref, rtol=1e-5, atol=1e-5), (shape, loss, ref)

    print("KERNEL_OK")
</pallas_src>

<mosaic_0001>
module attributes {stable_mosaic.version = 11 : i64} {
  func.func @_bce_logits_kernel(%arg0: i32, %arg1: i32, %arg2: memref<16x128xf32, #tpu.memory_space<vmem>>, %arg3: memref<16x128xf32, #tpu.memory_space<vmem>>, %arg4: memref<8x128xf32, #tpu.memory_space<vmem>>) attributes {dimension_semantics = [#tpu.dimension_semantics<parallel>, #tpu.dimension_semantics<arbitrary>], iteration_bounds = array<i64: 1, 1>, scalar_prefetch = 0 : i64, scratch_operands = 0 : i64, tpu.core_type = #tpu.core_type<tc>, window_params = [{transform_indices = @transform_0, window_bounds = array<i64: 16, 128>}, {transform_indices = @transform_1, window_bounds = array<i64: 16, 128>}, {transform_indices = @transform_2, window_bounds = array<i64: 8, 128>}]} {
    %c0_i32 = arith.constant 0 : i32
    %0 = arith.cmpi eq, %arg1, %c0_i32 : i32
    %1 = arith.extui %0 : i1 to i32
    %c0_i32_0 = arith.constant 0 : i32
    %2 = arith.cmpi ne, %1, %c0_i32_0 : i32
    scf.if %2 {
      %cst_10 = arith.constant 0.000000e+00 : f32
      %20 = vector.broadcast %cst_10 : f32 to vector<8x128xf32>
      %c0_11 = arith.constant 0 : index
      %c0_12 = arith.constant 0 : index
      %21 = vector.load %arg4[%c0_11, %c0_12] : memref<8x128xf32, #tpu.memory_space<vmem>>, vector<8x128xf32>
      tpu.vector_store %arg4[%c0_11, %c0_12], %20 {strides = array<i32>} : memref<8x128xf32, #tpu.memory_space<vmem>>, vector<8x128xf32>,
    } else {
    }
    %c0 = arith.constant 0 : index
    %c0_1 = arith.constant 0 : index
    %3 = vector.load %arg2[%c0, %c0_1] : memref<16x128xf32, #tpu.memory_space<vmem>>, vector<16x128xf32>
    %c0_2 = arith.constant 0 : index
    %c0_3 = arith.constant 0 : index
    %4 = vector.load %arg3[%c0_2, %c0_3] : memref<16x128xf32, #tpu.memory_space<vmem>>, vector<16x128xf32>
    %cst = arith.constant 0.000000e+00 : f32
    %5 = vector.broadcast %cst : f32 to vector<16x128xf32>
    %6 = arith.maximumf %3, %5 : vector<16x128xf32>
    %7 = arith.mulf %3, %4 : vector<16x128xf32>
    %8 = arith.subf %6, %7 : vector<16x128xf32>
    %9 = math.absf %3 : vector<16x128xf32>
    %cst_4 = arith.constant 0.000000e+00 : f32
    %10 = vector.broadcast %cst_4 : f32 to vector<16x128xf32>
    %11 = arith.subf %10, %9 : vector<16x128xf32>
    %12 = math.exp %11 : vector<16x128xf32>
    %13 = math.log1p %12 : vector<16x128xf32>
    %14 = arith.addf %8, %13 : vector<16x128xf32>
    %c0_5 = arith.constant 0 : index
    %c0_6 = arith.constant 0 : index
    %15 = vector.load %arg4[%c0_5, %c0_6] : memref<8x128xf32, #tpu.memory_space<vmem>>, vector<8x128xf32>
    %16 = vector.shape_cast %14 : vector<16x128xf32> to vector<2x8x128xf32>
    %cst_7 = arith.constant dense<0.000000e+00> : vector<8x128xf32>
    %17 = vector.multi_reduction <add>, %16, %cst_7 [0] : vector<2x8x128xf32> to vector<8x128xf32>
    %18 = arith.addf %15, %17 : vector<8x128xf32>
    %c0_8 = arith.constant 0 : index
    %c0_9 = arith.constant 0 : index
    %19 = vector.load %arg4[%c0_8, %c0_9] : memref<8x128xf32, #tpu.memory_space<vmem>>, vector<8x128xf32>
    tpu.vector_store %arg4[%c0_8, %c0_9], %18 {strides = array<i32>} : memref<8x128xf32, #tpu.memory_space<vmem>>, vector<8x128xf32>,
    return
  }
  func.func @transform_0(%arg0: i32, %arg1: i32) -> (i32, i32) {
    %c1_i32 = arith.constant 1 : i32
    %0 = arith.muli %arg0, %c1_i32 : i32
    %1 = arith.addi %0, %arg1 : i32
    %c0_i32 = arith.constant 0 : i32
    %c0_i32_0 = arith.constant 0 : i32
    return %1, %c0_i32 : i32, i32
  }
  func.func @transform_1(%arg0: i32, %arg1: i32) -> (i32, i32) {
    %c1_i32 = arith.constant 1 : i32
    %0 = arith.muli %arg0, %c1_i32 : i32
    %1 = arith.addi %0, %arg1 : i32
    %c0_i32 = arith.constant 0 : i32
    %c0_i32_0 = arith.constant 0 : i32
    return %1, %c0_i32 : i32, i32
  }
  func.func @transform_2(%arg0: i32, %arg1: i32) -> (i32, i32) {
    %c0_i32 = arith.constant 0 : i32
    %c0_i32_0 = arith.constant 0 : i32
    return %arg0, %c0_i32 : i32, i32
  }
}

</mosaic_0001>

<bundles_post_ra>
// kernel: tpu_custom_call.1
= control target key start
LH: loop header
LB: loop body
LE: loop exit
PB: predicated region body
PF: predicated region fallthrough
CT: control target
= control target key end

     0   :  { %7 = vsyncpa [#allocation3], 0  ;;  %s224_s0 = inlined_call_operand.hbm [shape: f32[16,128], index: 0, kind: input, shape index: {}]   ;;  %s225_s1 = inlined_call_operand.hbm [shape: f32[16,128], index: 1, kind: input, shape index: {}]   ;;  %s226_s2 = inlined_call_operand.hbm [shape: f32[8,128], index: 2, kind: output, shape index: {}]  }
   0x1   :  { %8 = vsyncpa [#allocation6], 0 }
   0x2   :  { %9 = vsyncpa [#allocation4], 0  ;;  %s195_s9 = smov [#allocation2]  }
   0x3   :  { %s19_s10 = sshll.u32 %s195_s9, 4  ;;  %s20_s10 = int_to_ptr.vmem [resolvable:$true] %s19_s10 }
   0x4   :  { %s137_s11 = scalar_lea.vmem %s20_s10, 256  ;;  %p142_p1 = scmp.lt.s32.totalorder %s20_s10, %s20_s10 }
   0x5   :  { %p138_p0 = scmp.ne.s32.totalorder %s20_s10, %s137_s11  ;;  %p143_p2 = scmp.lt.s32.totalorder %s137_s11, %s137_s11 }
   0x7   :  { %p144_p3 = por %p143_p2, %p142_p1 }
   0x9   :  { %p145_p4 = pnand %p144_p3, %p138_p0 }
   0xb   :  { %148 = shalt.err (!%p145_p4)
}
   0xc   :  { %s196_s12 = smov 128   ;;  %s197_s13 = smov 8  }
   0xd   :  { %25 = dma.hbm_to_vmem [thread:$0]  %s224_s0, 256, %s20_s10, [#allocation3], %s196_s12, %s196_s12, %s197_s13  }
   0xe   :  { %s198_s16 = smov [#allocation5]  }
   0xf   :  { %s35_s17 = sshll.u32 %s198_s16, 4  ;;  %s36_s17 = int_to_ptr.vmem [resolvable:$true] %s35_s17 }
  0x10   :  { %s157_s18 = scalar_lea.vmem %s36_s17, 256  ;;  %p162_p6 = scmp.lt.s32.totalorder %s36_s17, %s36_s17 }
  0x11   :  { %p158_p5 = scmp.ne.s32.totalorder %s36_s17, %s157_s18  ;;  %p163_p7 = scmp.lt.s32.totalorder %s157_s18, %s157_s18 }
  0x13   :  { %p164_p8 = por %p163_p7, %p162_p6 }
  0x15   :  { %p165_p9 = pnand %p164_p8, %p158_p5 }
  0x17   :  { %168 = shalt.err (!%p165_p9)
}
  0x18   :  { %41 = dma.hbm_to_vmem [thread:$0]  %s225_s1, 256, %s36_s17, [#allocation6], %s196_s12, %s196_s12, %s197_s13  }
  0x19   :  { %189 = dma.done.wait [#allocation3], 256  }
  0x1a   :  { %190 = vsyncadd [#allocation3], 4294967040 }
  0x1b   :  { %191 = dma.done.wait [#allocation6], 256  }
  0x1c   :  { %192 = vsyncadd [#allocation6], 4294967040  ;;  %v57_v0 = vld [vmem:[#allocation2] sm:$0xff]  ;;  %v58_v1 = vld [vmem:[#allocation2 + $0x8] sm:$0xff]  ;;  %s199_s0 = smov [#allocation7]  }
  0x1d   :  { %v67_v2 = vand.u32 2147483647, %v57_v0  ;;  %v68_v3 = vand.u32 2147483647, %v58_v1  ;;  %v59_v14 = vld [vmem:[#allocation5] sm:$0xff]  ;;  %v60_v15 = vld [vmem:[#allocation5 + $0x8] sm:$0xff] }
  0x1e   :  { %v61_v17 = vmax.f32 %v57_v0, 0.0  ;;  %v63_v18 = vmul.f32 %v59_v14, %v57_v0  ;;  %v62_v21 = vmax.f32 %v58_v1, 0.0  ;;  %v64_v22 = vmul.f32 %v60_v15, %v58_v1  ;;  %s105_s1 = sshll.u32 %s199_s0, 4  ;;  %s106_s1 = int_to_ptr.vmem [resolvable:$true] %s105_s1 }
  0x1f   :  { %v69_v4 = vsub.f32 0.0, %v67_v2  ;;  %v70_v5 = vsub.f32 0.0, %v68_v3  ;;  %s169_s21 = scalar_lea.vmem %s106_s1, 128  ;;  %p174_p11 = scmp.lt.s32.totalorder %s106_s1, %s106_s1 }
  0x20   :  { %v65_v26 = vsub.f32 %v61_v17, %v63_v18  ;;  %v66_v29 = vsub.f32 %v62_v21, %v64_v22  ;;  %p170_p10 = scmp.ne.s32.totalorder %s106_s1, %s169_s21  ;;  %p175_p12 = scmp.lt.s32.totalorder %s169_s21, %s169_s21 }
  0x21   :  { %v71_v6 = vmul.f32 1.442695, %v69_v4  ;;  %v73_v7 = vmul.f32 1.442695, %v70_v5 }
  0x22   :  { %p176_p13 = por %p175_p12, %p174_p11 }
  0x23   :  { %121 = vpow2.f32 %v71_v6 }
  0x24   :  { %123 = vpow2.f32 %v73_v7  ;;  %p177_p0 = pnand %p176_p13, %p170_p10 }
  0x30   :  { %v122_v8 = vpop.eup %121 }
  0x31   :  { %v124_v9 = vpop.eup %123  ;;  %v75_v10 = vadd.f32 1.0, %v122_v8  ;;  %v78_v12 = vmul.f32 -0.5, %v122_v8  ;;  %v81_v19 = vand.u32 2147483647, %v122_v8 }
  0x32   :  { %v84_v11 = vadd.f32 1.0, %v124_v9  ;;  %v87_v13 = vmul.f32 -0.5, %v124_v9  ;;  %v90_v23 = vand.u32 2147483647, %v124_v9 }
  0x33   :  { %125 = vlog2.f32 %v75_v10  ;;  %v79_v16 = vadd.f32 1.0, %v78_v12  ;;  %vm82_vm0 = vcmp.lt.f32.partialorder %v81_v19, 0.0004427343 }
  0x34   :  { %127 = vlog2.f32 %v84_v11  ;;  %v88_v20 = vadd.f32 1.0, %v87_v13  ;;  %vm91_vm1 = vcmp.lt.f32.partialorder %v90_v23, 0.0004427343 }
  0x35   :  { %v80_v24 = vmul.f32 %v122_v8, %v79_v16 }
  0x36   :  { %v89_v27 = vmul.f32 %v124_v9, %v88_v20 }
  0x40   :  { %v126_v25 = vpop.eup %125 }
  0x41   :  { %v128_v28 = vpop.eup %127  ;;  %v77_v30 = vmul.f32 0.6931472, %v126_v25 }
  0x42   :  { %v86_v31 = vmul.f32 0.6931472, %v128_v28 }
  0x43   :  { %v83_v32 = vsel %vm82_vm0, %v80_v24, %v77_v30 }
  0x44   :  { %v92_v33 = vsel %vm91_vm1, %v89_v27, %v86_v31  ;;  %v93_v34 = vadd.f32 %v83_v32, %v65_v26 }
  0x45   :  { %v94_v35 = vadd.f32 %v92_v33, %v66_v29 }
  0x47   :  { %v96_v36 = vadd.f32 %v94_v35, %v93_v34 }
  0x49   :  { %98 = vst [vmem:[#allocation7] sm:$0xff] %v96_v36 }
  0x4a   :  { %180 = shalt.err (!%p177_p0)
}
  0x4b   :  { %108 = dma.vmem_to_hbm [thread:$0]  %s106_s1, 128, %s226_s2, [#allocation4]  }
  0x4c   :  { %193 = dma.done.wait [#allocation4], 128  }
  0x4d   :  { %194 = vsyncadd [#allocation4], 4294967168 }
  0x4e   :  { %112 = vsyncpa [#allocation3], 1 }
  0x4f   :  { %113 = vsyncpa [#allocation6], 1 }
  0x50   :  { %114 = vsyncpa [#allocation4], 1 }

</bundles_post_ra>
